<compile_context>
chip_gen: v6e
topology: v6e:2x2x1
jax: 0.10.0
libtpu: 0.0.40
codegen_flags: <defaults>
</compile_context>

<pallas_src>
import jax
import jax.numpy as jnp
from jax import lax
from jax.experimental import pallas as pl
from jax.experimental.pallas import tpu as pltpu  # noqa: F401  (TPU backend)

B, T, D, H = 2, 8, 16, 32  # batch, seq, input_dim, hidden_dim
OUT = 1                    # output_dim

G4 = 4 * H                 # forward gate block  [i | f | o | g]  (128 lanes)
G3 = 3 * H                 # backward gate block [i | o | g]      ( 96 lanes)
G7 = G4 + G3               # fused projection width (224 lanes)


def bilstm_kernel(x_ref, w_in_ref, b_in_ref, whh_ref, head_ref, out_ref):
    # ---- Hoisted input projection: all timesteps, both directions, one bf16
    #      MXU pass.  x is time-major flat (T*B, D); i/f/o columns of w_in and
    #      b_in were pre-scaled by 0.5 host-side for the tanh-form sigmoid.
    x = x_ref[...].astype(jnp.bfloat16)                           # (T*B, D)
    gx = (jnp.dot(x, w_in_ref[...], preferred_element_type=jnp.float32)
          + b_in_ref[...])                                        # (T*B, 7H) f32
    gxf = gx[:, :G4]                                              # fwd gates

    whh = whh_ref[...]                                            # (H, 4H) bf16

    # ---- Forward recurrence, fully unrolled (T=8 static indices).
    #      State (h, c) and all elementwise gate math stay f32; only the dot
    #      operands are bf16 (single MXU pass per step).
    h = jnp.zeros((B, H), jnp.float32)
    c = jnp.zeros((B, H), jnp.float32)
    for t in range(T):
        z = gxf[t * B:(t + 1) * B, :] + jnp.dot(
            h.astype(jnp.bfloat16), whh, preferred_element_type=jnp.float32)
        th = jnp.tanh(z)                 # ONE EUP dispatch over all 4 gate blocks
        s = 0.5 * th + 0.5               # sigmoid via tanh identity (i|f|o valid)
        c = s[:, H:2 * H] * c + s[:, :H] * th[:, 3 * H:]
        h = s[:, 2 * H:3 * H] * jnp.tanh(c)

    # ---- Reverse direction at the last timestep == its first step from the
    #      zero state: whh_b and the forget gate were pruned host-side.
    gb = gx[(T - 1) * B:, G4:]           # (B, 3H) = [i | o | g], i/o pre-scaled
    tb = jnp.tanh(gb)
    sb = 0.5 * tb + 0.5
    cb = sb[:, :H] * tb[:, 2 * H:]
    hb = sb[:, H:2 * H] * jnp.tanh(cb)

    # ---- fc head (OUT=1): VPU multiply + lane reduce, no MXU, no concat.
    head = head_ref[...]                 # (1, 2H+1) = [wf | wb | bias]
    out = (jnp.sum(h * head[:, :H], axis=-1, keepdims=True)
           + jnp.sum(hb * head[:, H:2 * H], axis=-1, keepdims=True)
           + head[:, 2 * H:])
    out_ref[...] = out.astype(out_ref.dtype)


def prepare_params(p):
    """Host-side, ONE-TIME parameter prep from PyTorch-convention tensors.

    PyTorch gate order along the 4H axis is [i, f, g, o]; gates = x @ W_ih.T
    + h @ W_hh.T + b_ih + b_hh.  We pre-transpose, pre-sum biases, reorder
    gates to [i, f, o, g] (fwd) / [i, o, g] (bwd, forget dropped — valid for
    zero initial state + last-timestep head), pre-scale the sigmoid-gate
    (i/f/o) columns and biases by 0.5 so the kernel can use
    sigmoid(z) = 0.5*tanh(z/2) + 0.5, fuse both directions' input projections
    into one (D, 7H) matrix, and store the matmul weights in bf16.
    Call this ONCE and reuse the result; it must not sit on the per-call path.
    """
    def rows(w):
        return w[0 * H:1 * H], w[1 * H:2 * H], w[2 * H:3 * H], w[3 * H:4 * H]

    # Forward direction: [i, f, o, g], sigmoid columns pre-scaled by 0.5.
    i, f, g, o = rows(p["w_ih_f"])
    wih_f = jnp.concatenate([0.5 * i, 0.5 * f, 0.5 * o, g], axis=0).T  # (D, 4H)
    i, f, g, o = rows(p["w_hh_f"])
    whh_f = jnp.concatenate([0.5 * i, 0.5 * f, 0.5 * o, g], axis=0).T  # (H, 4H)
    b = p["b_ih_f"] + p["b_hh_f"]
    b_f = jnp.concatenate([0.5 * b[:H], 0.5 * b[H:2 * H],
                           0.5 * b[3 * H:], b[2 * H:3 * H]])

    # Backward direction: only [i, o, g] (zero-initial-state step), i/o scaled.
    i, f, g, o = rows(p["w_ih_b"])
    wih_b = jnp.concatenate([0.5 * i, 0.5 * o, g], axis=0).T           # (D, 3H)
    b = p["b_ih_b"] + p["b_hh_b"]
    b_b = jnp.concatenate([0.5 * b[:H], 0.5 * b[3 * H:], b[2 * H:3 * H]])

    w_in = jnp.concatenate([wih_f, wih_b], axis=1).astype(jnp.bfloat16)  # (D, 7H)
    b_in = jnp.concatenate([b_f, b_b])[None, :].astype(jnp.float32)      # (1, 7H)
    whh = whh_f.astype(jnp.bfloat16)                                     # (H, 4H)

    # Head packed into one lane-aligned operand: [wf (H) | wb (H) | bias (1)].
    head = jnp.concatenate([p["w_fc"][0, :H], p["w_fc"][0, H:],
                            p["b_fc"]])[None, :].astype(jnp.float32)     # (1, 2H+1)
    return w_in, b_in, whh, head


@jax.jit
def bilstm_forward(x, w_in, b_in, whh, head):
    """x: (B, T, D) float32 (batch_first) -> (B, OUT).

    Takes the ALREADY-PREPPED parameter tensors (see prepare_params); the only
    per-call XLA work is the tiny time-major transpose of x.
    """
    x_tm = jnp.transpose(x, (1, 0, 2)).reshape(T * B, D)   # time-major, flat
    return pl.pallas_call(
        bilstm_kernel,
        out_shape=jax.ShapeDtypeStruct((B, OUT), jnp.float32),
    )(x_tm, w_in, b_in, whh, head)


def init_params(key):
    """Deterministic init with PyTorch nn.LSTM / nn.Linear shapes."""
    k = 1.0 / jnp.sqrt(jnp.float32(H))
    keys = jax.random.split(key, 10)

    def u(kk, shape):
        return jax.random.uniform(kk, shape, jnp.float32, minval=-k, maxval=k)

    return {
        "w_ih_f": u(keys[0], (4 * H, D)), "w_hh_f": u(keys[1], (4 * H, H)),
        "b_ih_f": u(keys[2], (4 * H,)),   "b_hh_f": u(keys[3], (4 * H,)),
        "w_ih_b": u(keys[4], (4 * H, D)), "w_hh_b": u(keys[5], (4 * H, H)),
        "b_ih_b": u(keys[6], (4 * H,)),   "b_hh_b": u(keys[7], (4 * H,)),
        "w_fc": u(keys[8], (OUT, 2 * H)), "b_fc": u(keys[9], (OUT,)),
    }


def bilstm_reference(x, p):
    """Pure-JAX f32 reference: full bidirectional LSTM (PyTorch semantics),
    then fc applied to the last timestep of the concatenated outputs."""
    def cell(x_t, h, c, w_ih, w_hh, b):
        gates = x_t @ w_ih.T + h @ w_hh.T + b
        i = jax.nn.sigmoid(gates[:, 0 * H:1 * H])
        f = jax.nn.sigmoid(gates[:, 1 * H:2 * H])
        g = jnp.tanh(gates[:, 2 * H:3 * H])
        o = jax.nn.sigmoid(gates[:, 3 * H:4 * H])
        c_new = f * c + i * g
        return o * jnp.tanh(c_new), c_new

    zeros = jnp.zeros((B, H), jnp.float32)
    x_tm = jnp.transpose(x, (1, 0, 2))

    def run(seq, w_ih, w_hh, b):
        def body(carry, x_t):
            h, c = cell(x_t, carry[0], carry[1], w_ih, w_hh, b)
            return (h, c), h
        _, hs = lax.scan(body, (zeros, zeros), seq)
        return hs                               # (T, B, H)

    hs_f = run(x_tm, p["w_ih_f"], p["w_hh_f"], p["b_ih_f"] + p["b_hh_f"])
    hs_b = run(x_tm[::-1], p["w_ih_b"], p["w_hh_b"],
               p["b_ih_b"] + p["b_hh_b"])[::-1]
    last = jnp.concatenate([hs_f[-1], hs_b[-1]], axis=1)   # (B, 2H)
    return last @ p["w_fc"].T + p["b_fc"][None, :]


if __name__ == "__main__":
    key = jax.random.PRNGKey(0)
    kx, kp = jax.random.split(key)
    x = jax.random.normal(kx, (B, T, D), jnp.float32)
    params = init_params(kp)

    # One-time prep (hoisted out of the per-call / jitted path).
    prepped = prepare_params(params)

    out = jax.block_until_ready(bilstm_forward(x, *prepped))
    ref = bilstm_reference(x, params)

    assert out.shape == (B, OUT)
    # Tolerance loosened vs. the pure-f32 reference because the kernel uses
    # single-pass bf16 MXU matmuls (f32 accumulation) — a deliberate
    # precision/latency tradeoff from the performance review, not a bug.
    assert jnp.allclose(out, ref, atol=5e-2, rtol=5e-2), (out, ref)

    print("KERNEL_OK")
</pallas_src>

<mosaic_0001>
module attributes {stable_mosaic.version = 11 : i64} {
  func.func @bilstm_kernel(%arg0: memref<16x16xf32, #tpu.memory_space<vmem>>, %arg1: memref<16x224xbf16, #tpu.memory_space<vmem>>, %arg2: memref<1x224xf32, #tpu.memory_space<vmem>>, %arg3: memref<32x128xbf16, #tpu.memory_space<vmem>>, %arg4: memref<1x65xf32, #tpu.memory_space<vmem>>, %arg5: memref<2x1xf32, #tpu.memory_space<vmem>>) attributes {dimension_semantics = [], scalar_prefetch = 0 : i64, scratch_operands = 0 : i64, tpu.core_type = #tpu.core_type<tc>} {
    %c0 = arith.constant 0 : index
    %c0_0 = arith.constant 0 : index
    %0 = vector.load %arg0[%c0, %c0_0] : memref<16x16xf32, #tpu.memory_space<vmem>>, vector<16x16xf32>
    %1 = arith.truncf %0 : vector<16x16xf32> to vector<16x16xbf16>
    %c0_1 = arith.constant 0 : index
    %c0_2 = arith.constant 0 : index
    %2 = vector.load %arg1[%c0_1, %c0_2] : memref<16x224xbf16, #tpu.memory_space<vmem>>, vector<16x224xbf16>
    %cst = arith.constant dense<0.000000e+00> : vector<16x224xf32>
    %3 = tpu.matmul %1, %2, %cst {dimension_numbers = #tpu.dot_dimension_numbers<[1], [0], [0], [1], [0, 0, 1, 1], [], []>} : vector<16x16xbf16>, vector<16x224xbf16>, vector<16x224xf32> -> vector<16x224xf32>
    %c0_3 = arith.constant 0 : index
    %c0_4 = arith.constant 0 : index
    %4 = vector.load %arg2[%c0_3, %c0_4] : memref<1x224xf32, #tpu.memory_space<vmem>>, vector<1x224xf32>
    %5 = vector.broadcast %4 : vector<1x224xf32> to vector<16x224xf32>
    %6 = arith.addf %3, %5 : vector<16x224xf32>
    %7 = vector.extract_strided_slice %6 {offsets = [0, 0], sizes = [16, 128], strides = [1, 1]} : vector<16x224xf32> to vector<16x128xf32>
    %c0_5 = arith.constant 0 : index
    %c0_6 = arith.constant 0 : index
    %8 = vector.load %arg3[%c0_5, %c0_6] : memref<32x128xbf16, #tpu.memory_space<vmem>>, vector<32x128xbf16>
    %cst_7 = arith.constant 0.000000e+00 : f32
    %9 = vector.broadcast %cst_7 : f32 to vector<2x32xf32>
    %cst_8 = arith.constant 0.000000e+00 : f32
    %10 = vector.broadcast %cst_8 : f32 to vector<2x32xf32>
    %11 = vector.extract_strided_slice %7 {offsets = [0, 0], sizes = [2, 128], strides = [1, 1]} : vector<16x128xf32> to vector<2x128xf32>
    %12 = arith.truncf %9 : vector<2x32xf32> to vector<2x32xbf16>
    %cst_9 = arith.constant dense<0.000000e+00> : vector<2x128xf32>
    %13 = tpu.matmul %12, %8, %cst_9 {dimension_numbers = #tpu.dot_dimension_numbers<[1], [0], [0], [1], [0, 0, 1, 1], [], []>} : vector<2x32xbf16>, vector<32x128xbf16>, vector<2x128xf32> -> vector<2x128xf32>
    %14 = arith.addf %11, %13 : vector<2x128xf32>
    %15 = math.tanh %14 : vector<2x128xf32>
    %cst_10 = arith.constant 5.000000e-01 : f32
    %16 = vector.broadcast %cst_10 : f32 to vector<2x128xf32>
    %17 = arith.mulf %16, %15 : vector<2x128xf32>
    %cst_11 = arith.constant 5.000000e-01 : f32
    %18 = vector.broadcast %cst_11 : f32 to vector<2x128xf32>
    %19 = arith.addf %17, %18 : vector<2x128xf32>
    %20 = vector.extract_strided_slice %19 {offsets = [0, 32], sizes = [2, 32], strides = [1, 1]} : vector<2x128xf32> to vector<2x32xf32>
    %21 = arith.mulf %20, %10 : vector<2x32xf32>
    %22 = vector.extract_strided_slice %19 {offsets = [0, 0], sizes = [2, 32], strides = [1, 1]} : vector<2x128xf32> to vector<2x32xf32>
    %23 = vector.extract_strided_slice %15 {offsets = [0, 96], sizes = [2, 32], strides = [1, 1]} : vector<2x128xf32> to vector<2x32xf32>
    %24 = arith.mulf %22, %23 : vector<2x32xf32>
    %25 = arith.addf %21, %24 : vector<2x32xf32>
    %26 = vector.extract_strided_slice %19 {offsets = [0, 64], sizes = [2, 32], strides = [1, 1]} : vector<2x128xf32> to vector<2x32xf32>
    %27 = math.tanh %25 : vector<2x32xf32>
    %28 = arith.mulf %26, %27 : vector<2x32xf32>
    %29 = vector.extract_strided_slice %7 {offsets = [2, 0], sizes = [2, 128], strides = [1, 1]} : vector<16x128xf32> to vector<2x128xf32>
    %30 = arith.truncf %28 : vector<2x32xf32> to vector<2x32xbf16>
    %cst_12 = arith.constant dense<0.000000e+00> : vector<2x128xf32>
    %31 = tpu.matmul %30, %8, %cst_12 {dimension_numbers = #tpu.dot_dimension_numbers<[1], [0], [0], [1], [0, 0, 1, 1], [], []>} : vector<2x32xbf16>, vector<32x128xbf16>, vector<2x128xf32> -> vector<2x128xf32>
    %32 = arith.addf %29, %31 : vector<2x128xf32>
    %33 = math.tanh %32 : vector<2x128xf32>
    %cst_13 = arith.constant 5.000000e-01 : f32
    %34 = vector.broadcast %cst_13 : f32 to vector<2x128xf32>
    %35 = arith.mulf %34, %33 : vector<2x128xf32>
    %cst_14 = arith.constant 5.000000e-01 : f32
    %36 = vector.broadcast %cst_14 : f32 to vector<2x128xf32>
    %37 = arith.addf %35, %36 : vector<2x128xf32>
    %38 = vector.extract_strided_slice %37 {offsets = [0, 32], sizes = [2, 32], strides = [1, 1]} : vector<2x128xf32> to vector<2x32xf32>
    %39 = arith.mulf %38, %25 : vector<2x32xf32>
    %40 = vector.extract_strided_slice %37 {offsets = [0, 0], sizes = [2, 32], strides = [1, 1]} : vector<2x128xf32> to vector<2x32xf32>
    %41 = vector.extract_strided_slice %33 {offsets = [0, 96], sizes = [2, 32], strides = [1, 1]} : vector<2x128xf32> to vector<2x32xf32>
    %42 = arith.mulf %40, %41 : vector<2x32xf32>
    %43 = arith.addf %39, %42 : vector<2x32xf32>
    %44 = vector.extract_strided_slice %37 {offsets = [0, 64], sizes = [2, 32], strides = [1, 1]} : vector<2x128xf32> to vector<2x32xf32>
    %45 = math.tanh %43 : vector<2x32xf32>
    %46 = arith.mulf %44, %45 : vector<2x32xf32>
    %47 = vector.extract_strided_slice %7 {offsets = [4, 0], sizes = [2, 128], strides = [1, 1]} : vector<16x128xf32> to vector<2x128xf32>
    %48 = arith.truncf %46 : vector<2x32xf32> to vector<2x32xbf16>
    %cst_15 = arith.constant dense<0.000000e+00> : vector<2x128xf32>
    %49 = tpu.matmul %48, %8, %cst_15 {dimension_numbers = #tpu.dot_dimension_numbers<[1], [0], [0], [1], [0, 0, 1, 1], [], []>} : vector<2x32xbf16>, vector<32x128xbf16>, vector<2x128xf32> -> vector<2x128xf32>
    %50 = arith.addf %47, %49 : vector<2x128xf32>
    %51 = math.tanh %50 : vector<2x128xf32>
    %cst_16 = arith.constant 5.000000e-01 : f32
    %52 = vector.broadcast %cst_16 : f32 to vector<2x128xf32>
    %53 = arith.mulf %52, %51 : vector<2x128xf32>
    %cst_17 = arith.constant 5.000000e-01 : f32
    %54 = vector.broadcast %cst_17 : f32 to vector<2x128xf32>
    %55 = arith.addf %53, %54 : vector<2x128xf32>
    %56 = vector.extract_strided_slice %55 {offsets = [0, 32], sizes = [2, 32], strides = [1, 1]} : vector<2x128xf32> to vector<2x32xf32>
    %57 = arith.mulf %56, %43 : vector<2x32xf32>
    %58 = vector.extract_strided_slice %55 {offsets = [0, 0], sizes = [2, 32], strides = [1, 1]} : vector<2x128xf32> to vector<2x32xf32>
    %59 = vector.extract_strided_slice %51 {offsets = [0, 96], sizes = [2, 32], strides = [1, 1]} : vector<2x128xf32> to vector<2x32xf32>
    %60 = arith.mulf %58, %59 : vector<2x32xf32>
    %61 = arith.addf %57, %60 : vector<2x32xf32>
    %62 = vector.extract_strided_slice %55 {offsets = [0, 64], sizes = [2, 32], strides = [1, 1]} : vector<2x128xf32> to vector<2x32xf32>
    %63 = math.tanh %61 : vector<2x32xf32>
    %64 = arith.mulf %62, %63 : vector<2x32xf32>
    %65 = vector.extract_strided_slice %7 {offsets = [6, 0], sizes = [2, 128], strides = [1, 1]} : vector<16x128xf32> to vector<2x128xf32>
    %66 = arith.truncf %64 : vector<2x32xf32> to vector<2x32xbf16>
    %cst_18 = arith.constant dense<0.000000e+00> : vector<2x128xf32>
    %67 = tpu.matmul %66, %8, %cst_18 {dimension_numbers = #tpu.dot_dimension_numbers<[1], [0], [0], [1], [0, 0, 1, 1], [], []>} : vector<2x32xbf16>, vector<32x128xbf16>, vector<2x128xf32> -> vector<2x128xf32>
    %68 = arith.addf %65, %67 : vector<2x128xf32>
    %69 = math.tanh %68 : vector<2x128xf32>
    %cst_19 = arith.constant 5.000000e-01 : f32
    %70 = vector.broadcast %cst_19 : f32 to vector<2x128xf32>
    %71 = arith.mulf %70, %69 : vector<2x128xf32>
    %cst_20 = arith.constant 5.000000e-01 : f32
    %72 = vector.broadcast %cst_20 : f32 to vector<2x128xf32>
    %73 = arith.addf %71, %72 : vector<2x128xf32>
    %74 = vector.extract_strided_slice %73 {offsets = [0, 32], sizes = [2, 32], strides = [1, 1]} : vector<2x128xf32> to vector<2x32xf32>
    %75 = arith.mulf %74, %61 : vector<2x32xf32>
    %76 = vector.extract_strided_slice %73 {offsets = [0, 0], sizes = [2, 32], strides = [1, 1]} : vector<2x128xf32> to vector<2x32xf32>
    %77 = vector.extract_strided_slice %69 {offsets = [0, 96], sizes = [2, 32], strides = [1, 1]} : vector<2x128xf32> to vector<2x32xf32>
    %78 = arith.mulf %76, %77 : vector<2x32xf32>
    %79 = arith.addf %75, %78 : vector<2x32xf32>
    %80 = vector.extract_strided_slice %73 {offsets = [0, 64], sizes = [2, 32], strides = [1, 1]} : vector<2x128xf32> to vector<2x32xf32>
    %81 = math.tanh %79 : vector<2x32xf32>
    %82 = arith.mulf %80, %81 : vector<2x32xf32>
    %83 = vector.extract_strided_slice %7 {offsets = [8, 0], sizes = [2, 128], strides = [1, 1]} : vector<16x128xf32> to vector<2x128xf32>
    %84 = arith.truncf %82 : vector<2x32xf32> to vector<2x32xbf16>
    %cst_21 = arith.constant dense<0.000000e+00> : vector<2x128xf32>
    %85 = tpu.matmul %84, %8, %cst_21 {dimension_numbers = #tpu.dot_dimension_numbers<[1], [0], [0], [1], [0, 0, 1, 1], [], []>} : vector<2x32xbf16>, vector<32x128xbf16>, vector<2x128xf32> -> vector<2x128xf32>
    %86 = arith.addf %83, %85 : vector<2x128xf32>
    %87 = math.tanh %86 : vector<2x128xf32>
    %cst_22 = arith.constant 5.000000e-01 : f32
    %88 = vector.broadcast %cst_22 : f32 to vector<2x128xf32>
    %89 = arith.mulf %88, %87 : vector<2x128xf32>
    %cst_23 = arith.constant 5.000000e-01 : f32
    %90 = vector.broadcast %cst_23 : f32 to vector<2x128xf32>
    %91 = arith.addf %89, %90 : vector<2x128xf32>
    %92 = vector.extract_strided_slice %91 {offsets = [0, 32], sizes = [2, 32], strides = [1, 1]} : vector<2x128xf32> to vector<2x32xf32>
    %93 = arith.mulf %92, %79 : vector<2x32xf32>
    %94 = vector.extract_strided_slice %91 {offsets = [0, 0], sizes = [2, 32], strides = [1, 1]} : vector<2x128xf32> to vector<2x32xf32>
    %95 = vector.extract_strided_slice %87 {offsets = [0, 96], sizes = [2, 32], strides = [1, 1]} : vector<2x128xf32> to vector<2x32xf32>
    %96 = arith.mulf %94, %95 : vector<2x32xf32>
    %97 = arith.addf %93, %96 : vector<2x32xf32>
    %98 = vector.extract_strided_slice %91 {offsets = [0, 64], sizes = [2, 32], strides = [1, 1]} : vector<2x128xf32> to vector<2x32xf32>
    %99 = math.tanh %97 : vector<2x32xf32>
    %100 = arith.mulf %98, %99 : vector<2x32xf32>
    %101 = vector.extract_strided_slice %7 {offsets = [10, 0], sizes = [2, 128], strides = [1, 1]} : vector<16x128xf32> to vector<2x128xf32>
    %102 = arith.truncf %100 : vector<2x32xf32> to vector<2x32xbf16>
    %cst_24 = arith.constant dense<0.000000e+00> : vector<2x128xf32>
    %103 = tpu.matmul %102, %8, %cst_24 {dimension_numbers = #tpu.dot_dimension_numbers<[1], [0], [0], [1], [0, 0, 1, 1], [], []>} : vector<2x32xbf16>, vector<32x128xbf16>, vector<2x128xf32> -> vector<2x128xf32>
    %104 = arith.addf %101, %103 : vector<2x128xf32>
    %105 = math.tanh %104 : vector<2x128xf32>
    %cst_25 = arith.constant 5.000000e-01 : f32
    %106 = vector.broadcast %cst_25 : f32 to vector<2x128xf32>
    %107 = arith.mulf %106, %105 : vector<2x128xf32>
    %cst_26 = arith.constant 5.000000e-01 : f32
    %108 = vector.broadcast %cst_26 : f32 to vector<2x128xf32>
    %109 = arith.addf %107, %108 : vector<2x128xf32>
    %110 = vector.extract_strided_slice %109 {offsets = [0, 32], sizes = [2, 32], strides = [1, 1]} : vector<2x128xf32> to vector<2x32xf32>
    %111 = arith.mulf %110, %97 : vector<2x32xf32>
    %112 = vector.extract_strided_slice %109 {offsets = [0, 0], sizes = [2, 32], strides = [1, 1]} : vector<2x128xf32> to vector<2x32xf32>
    %113 = vector.extract_strided_slice %105 {offsets = [0, 96], sizes = [2, 32], strides = [1, 1]} : vector<2x128xf32> to vector<2x32xf32>
    %114 = arith.mulf %112, %113 : vector<2x32xf32>
    %115 = arith.addf %111, %114 : vector<2x32xf32>
    %116 = vector.extract_strided_slice %109 {offsets = [0, 64], sizes = [2, 32], strides = [1, 1]} : vector<2x128xf32> to vector<2x32xf32>
    %117 = math.tanh %115 : vector<2x32xf32>
    %118 = arith.mulf %116, %117 : vector<2x32xf32>
    %119 = vector.extract_strided_slice %7 {offsets = [12, 0], sizes = [2, 128], strides = [1, 1]} : vector<16x128xf32> to vector<2x128xf32>
    %120 = arith.truncf %118 : vector<2x32xf32> to vector<2x32xbf16>
    %cst_27 = arith.constant dense<0.000000e+00> : vector<2x128xf32>
    %121 = tpu.matmul %120, %8, %cst_27 {dimension_numbers = #tpu.dot_dimension_numbers<[1], [0], [0], [1], [0, 0, 1, 1], [], []>} : vector<2x32xbf16>, vector<32x128xbf16>, vector<2x128xf32> -> vector<2x128xf32>
    %122 = arith.addf %119, %121 : vector<2x128xf32>
    %123 = math.tanh %122 : vector<2x128xf32>
    %cst_28 = arith.constant 5.000000e-01 : f32
    %124 = vector.broadcast %cst_28 : f32 to vector<2x128xf32>
    %125 = arith.mulf %124, %123 : vector<2x128xf32>
    %cst_29 = arith.constant 5.000000e-01 : f32
    %126 = vector.broadcast %cst_29 : f32 to vector<2x128xf32>
    %127 = arith.addf %125, %126 : vector<2x128xf32>
    %128 = vector.extract_strided_slice %127 {offsets = [0, 32], sizes = [2, 32], strides = [1, 1]} : vector<2x128xf32> to vector<2x32xf32>
    %129 = arith.mulf %128, %115 : vector<2x32xf32>
    %130 = vector.extract_strided_slice %127 {offsets = [0, 0], sizes = [2, 32], strides = [1, 1]} : vector<2x128xf32> to vector<2x32xf32>
    %131 = vector.extract_strided_slice %123 {offsets = [0, 96], sizes = [2, 32], strides = [1, 1]} : vector<2x128xf32> to vector<2x32xf32>
    %132 = arith.mulf %130, %131 : vector<2x32xf32>
    %133 = arith.addf %129, %132 : vector<2x32xf32>
    %134 = vector.extract_strided_slice %127 {offsets = [0, 64], sizes = [2, 32], strides = [1, 1]} : vector<2x128xf32> to vector<2x32xf32>
    %135 = math.tanh %133 : vector<2x32xf32>
    %136 = arith.mulf %134, %135 : vector<2x32xf32>
    %137 = vector.extract_strided_slice %7 {offsets = [14, 0], sizes = [2, 128], strides = [1, 1]} : vector<16x128xf32> to vector<2x128xf32>
    %138 = arith.truncf %136 : vector<2x32xf32> to vector<2x32xbf16>
    %cst_30 = arith.constant dense<0.000000e+00> : vector<2x128xf32>
    %139 = tpu.matmul %138, %8, %cst_30 {dimension_numbers = #tpu.dot_dimension_numbers<[1], [0], [0], [1], [0, 0, 1, 1], [], []>} : vector<2x32xbf16>, vector<32x128xbf16>, vector<2x128xf32> -> vector<2x128xf32>
    %140 = arith.addf %137, %139 : vector<2x128xf32>
    %141 = math.tanh %140 : vector<2x128xf32>
    %cst_31 = arith.constant 5.000000e-01 : f32
    %142 = vector.broadcast %cst_31 : f32 to vector<2x128xf32>
    %143 = arith.mulf %142, %141 : vector<2x128xf32>
    %cst_32 = arith.constant 5.000000e-01 : f32
    %144 = vector.broadcast %cst_32 : f32 to vector<2x128xf32>
    %145 = arith.addf %143, %144 : vector<2x128xf32>
    %146 = vector.extract_strided_slice %145 {offsets = [0, 32], sizes = [2, 32], strides = [1, 1]} : vector<2x128xf32> to vector<2x32xf32>
    %147 = arith.mulf %146, %133 : vector<2x32xf32>
    %148 = vector.extract_strided_slice %145 {offsets = [0, 0], sizes = [2, 32], strides = [1, 1]} : vector<2x128xf32> to vector<2x32xf32>
    %149 = vector.extract_strided_slice %141 {offsets = [0, 96], sizes = [2, 32], strides = [1, 1]} : vector<2x128xf32> to vector<2x32xf32>
    %150 = arith.mulf %148, %149 : vector<2x32xf32>
    %151 = arith.addf %147, %150 : vector<2x32xf32>
    %152 = vector.extract_strided_slice %145 {offsets = [0, 64], sizes = [2, 32], strides = [1, 1]} : vector<2x128xf32> to vector<2x32xf32>
    %153 = math.tanh %151 : vector<2x32xf32>
    %154 = arith.mulf %152, %153 : vector<2x32xf32>
    %155 = vector.extract_strided_slice %6 {offsets = [14, 128], sizes = [2, 96], strides = [1, 1]} : vector<16x224xf32> to vector<2x96xf32>
    %156 = math.tanh %155 : vector<2x96xf32>
    %cst_33 = arith.constant 5.000000e-01 : f32
    %157 = vector.broadcast %cst_33 : f32 to vector<2x96xf32>
    %158 = arith.mulf %157, %156 : vector<2x96xf32>
    %cst_34 = arith.constant 5.000000e-01 : f32
    %159 = vector.broadcast %cst_34 : f32 to vector<2x96xf32>
    %160 = arith.addf %158, %159 : vector<2x96xf32>
    %161 = vector.extract_strided_slice %160 {offsets = [0, 0], sizes = [2, 32], strides = [1, 1]} : vector<2x96xf32> to vector<2x32xf32>
    %162 = vector.extract_strided_slice %156 {offsets = [0, 64], sizes = [2, 32], strides = [1, 1]} : vector<2x96xf32> to vector<2x32xf32>
    %163 = arith.mulf %161, %162 : vector<2x32xf32>
    %164 = vector.extract_strided_slice %160 {offsets = [0, 32], sizes = [2, 32], strides = [1, 1]} : vector<2x96xf32> to vector<2x32xf32>
    %165 = math.tanh %163 : vector<2x32xf32>
    %166 = arith.mulf %164, %165 : vector<2x32xf32>
    %c0_35 = arith.constant 0 : index
    %c0_36 = arith.constant 0 : index
    %167 = vector.load %arg4[%c0_35, %c0_36] : memref<1x65xf32, #tpu.memory_space<vmem>>, vector<1x65xf32>
    %168 = vector.extract_strided_slice %167 {offsets = [0, 0], sizes = [1, 32], strides = [1, 1]} : vector<1x65xf32> to vector<1x32xf32>
    %169 = vector.broadcast %168 : vector<1x32xf32> to vector<2x32xf32>
    %170 = arith.mulf %154, %169 : vector<2x32xf32>
    %cst_37 = arith.constant dense<0.000000e+00> : vector<2xf32>
    %171 = vector.multi_reduction <add>, %170, %cst_37 [1] : vector<2x32xf32> to vector<2xf32>
    %172 = vector.shape_cast %171 : vector<2xf32> to vector<2x1xf32>
    %173 = vector.extract_strided_slice %167 {offsets = [0, 32], sizes = [1, 32], strides = [1, 1]} : vector<1x65xf32> to vector<1x32xf32>
    %174 = vector.broadcast %173 : vector<1x32xf32> to vector<2x32xf32>
    %175 = arith.mulf %166, %174 : vector<2x32xf32>
    %cst_38 = arith.constant dense<0.000000e+00> : vector<2xf32>
    %176 = vector.multi_reduction <add>, %175, %cst_38 [1] : vector<2x32xf32> to vector<2xf32>
    %177 = vector.shape_cast %176 : vector<2xf32> to vector<2x1xf32>
    %178 = arith.addf %172, %177 : vector<2x1xf32>
    %179 = vector.extract_strided_slice %167 {offsets = [0, 64], sizes = [1, 1], strides = [1, 1]} : vector<1x65xf32> to vector<1x1xf32>
    %180 = vector.broadcast %179 : vector<1x1xf32> to vector<2x1xf32>
    %181 = arith.addf %178, %180 : vector<2x1xf32>
    %c0_39 = arith.constant 0 : index
    %c0_40 = arith.constant 0 : index
    %182 = vector.load %arg5[%c0_39, %c0_40] : memref<2x1xf32, #tpu.memory_space<vmem>>, vector<2x1xf32>
    tpu.vector_store %arg5[%c0_39, %c0_40], %181 {strides = array<i32>} : memref<2x1xf32, #tpu.memory_space<vmem>>, vector<2x1xf32>,
    return
  }
}

</mosaic_0001>

<bundles_post_ra>
// kernel: bilstm_forward.1
= control target key start
LH: loop header
LB: loop body
LE: loop exit
PB: predicated region body
PF: predicated region fallthrough
CT: control target
= control target key end

     0   :  { %v896_v0 = vmov 0.0   ;;  %v897_v2 = vmov 0   ;;  %vm898_vm0 = vmmov 0   ;;  %vm48_vm1 = vcmask 130048   ;;  %s901_s7 = smov 96   ;;  %s1077_s1 = inlined_call_operand.vmem [shape: bf16[16,224], index: 1, kind: input, shape index: {}]   ;;  %s1078_s3 = inlined_call_operand.vmem [shape: bf16[32,128], index: 3, kind: input, shape index: {}]   ;;  %s1079_s0 = inlined_call_operand.vmem [shape: f32[16,16], index: 0, kind: input, shape index: {}]   ;;  %s1080_s2 = inlined_call_operand.vmem [shape: f32[1,224], index: 2, kind: input, shape index: {}]   ;;  %s1081_s4 = inlined_call_operand.vmem [shape: f32[1,65], index: 4, kind: input, shape index: {}]   ;;  %s1082_s5 = inlined_call_operand.vmem [shape: f32[2,1], index: 5, kind: output, shape index: {}]  }
   0x1   :  { %785 = vmatprep.subr.bf16.mxu1 %v896_v0  ;;  %v855_v1 = vld [vmem:[%s1077_s1 + $0x4] ss:$8 sps:$4 sm:$0xff]   ;;  %84 = vmatprep.mubr.bf16.mxu0 %v897_v2  ;;  %v858_v4 = vld [vmem:[%s1077_s1] ss:$8 sps:$4 sm:$0xff]   ;;  %v28_v9 = vlaneseq  ;;  %vm110_vm2 = vcmask 261120   ;;  %vm723_vm3 = vcmask 261126  }
   0x2   :  { %v939_v3 = vld [vmem:[%s1078_s3 + $0x8] sm:$0xff]   ;;  %789 = vmatprep.mubr.msk.bf16.mxu1 %vm898_vm0, %v896_v0  ;;  %66 = vmatprep.subr.bf16.mxu0 %v855_v1  ;;  %v21_v5 = vld [vmem:[%s1079_s0] sm:$0xff]  ;;  %vm742_vm4 = vcmask 7174  }
   0x3   :  { %v22_v6 = vld [vmem:[%s1079_s0 + $0x8] sm:$0xff]  ;;  %786 = vmatpush3.bf16.msra.mxu1 %v939_v3  ;;  %v956_v8 = vld [vmem:[%s1078_s3] sm:$0xff]   ;;  %67 = vmatpush1.bf16.msra.mxu0 %v858_v4  ;;  %v974_v10 = vshrl.u32 %v28_v9, 7  ;;  %s899_s3 = smov 32  }
   0x4   :  { %v23_v7 = vpack.c.bf16 %v22_v6, %v21_v5  ;;  %787 = vmatprep.subr.bf16.mxu1 %v896_v0  ;;  %793 = vmatprep.subr.bf16.mxu0 %v896_v0  ;;  %v980_v12 = vld [vmem:[%s1080_s2] sm:$0x3]  ;;  %s900_s2 = smov 64  }
   0x5   :  { %v30_v11 = vsub.s32 0, %v974_v10 }
   0x6   :  { %750 = vmatmul.mubr.msk.bf16.vlgmr.msra.gmra.mxu0 %vm48_vm1, %v23_v7 }
   0x7   :  { %788 = vmatpush3.bf16.msra.mxu1 %v956_v8  ;;  %794 = vmatpush3.bf16.msra.mxu0 %v939_v3  ;;  %v31_v13 = vrot.slane %v980_v12, %v30_v11 }
   0x8   :  { %797 = vmatprep.mubr.msk.bf16.mxu0 %vm898_vm0, %v896_v0  ;;  %795 = vmatprep.subr.bf16.mxu0 %v896_v0 }
   0x9   :  { %801 = vmatprep.subr.bf16.mxu1 %v896_v0 }
   0xa   :  { %790 = vmatmul.mubr.bf16.vlgmr.msra.gmra.mxu1 %v897_v2 }
   0xb   :  { %802 = vmatpush3.bf16.msra.mxu1 %v939_v3  ;;  %805 = vmatprep.mubr.msk.bf16.mxu1 %vm898_vm0, %v896_v0 }
   0xc   :  { %796 = vmatpush3.bf16.msra.mxu0 %v956_v8  ;;  %803 = vmatprep.subr.bf16.mxu1 %v896_v0 }
   0xd   :  { %809 = vmatprep.subr.bf16.mxu0 %v896_v0 }
   0xf   :  { %804 = vmatpush3.bf16.msra.mxu1 %v956_v8 }
  0x10   :  { %817 = vmatprep.subr.bf16.mxu1 %v896_v0 }
  0xc6   :  { %v86_v14 = vpop.f32.mrf.mxu0 }
  0xc7   :  { %v983_v15 = vadd.f32 %v86_v14, %v31_v13 }
  0xc8   :  { %v88_v16 = vpop.f32.mrf.mxu0 }
  0xca   :  { %v148_v17 = vpop.f32.mrf.mxu1  ;;  %v89_v19 = vpop.f32.mrf.mxu0 }
  0xcb   :  { %v154_v18 = vadd.f32 %v148_v17, %v983_v15  ;;  %v986_v20 = vadd.f32 %v89_v19, %v31_v13 }
  0xcc   :  { %v791_v21 = vpop.f32.mrf.mxu1  ;;  %v999_v37 = vpop.f32.mrf.mxu0 }
  0xcd   :  { %860 = vtanh.f32 %v154_v18 }
  0xce   :  { %v151_v22 = vpop.f32.mrf.mxu1 }
  0xd0   :  { %v792_v23 = vpop.f32.mrf.mxu1 }
  0xda   :  { %v861_v24 = vpop.eup %860 }
  0xdb   :  { %160 = vrot.lane.b32.xlu0 %v861_v24, %s899_s3  ;;  %v156_v25 = vmul.f32 0.5, %v861_v24 }
  0xdd   :  { %v157_v26 = vadd.f32 0.5, %v156_v25 }
  0xdf   :  { %v158_v29 = vmul.f32 0.0, %v157_v26 }
 0x14d   :  { %v161_v27 = vpop.permute.xlu0 %160 }
 0x14e   :  { %v163_v28 = vmul.f32 %v161_v27, %v157_v26 }
 0x150   :  { %165 = vrot.lane.b32.xlu0 %v163_v28, %s899_s3 }
 0x1c2   :  { %v166_v30 = vpop.permute.xlu0 %165 }
 0x1c3   :  { %v168_v31 = vadd.f32 %v166_v30, %v158_v29 }
 0x1c5   :  { %862 = vtanh.f32 %v168_v31  ;;  %v230_v49 = vrot.slane %v168_v31, 6 }
 0x1d2   :  { %v863_v32 = vpop.eup %862 }
 0x1d3   :  { %171 = vrot.lane.b32.xlu1 %v863_v32, %s899_s3 }
 0x245   :  { %v172_v33 = vpop.permute.xlu1 %171 }
 0x246   :  { %v174_v34 = vmul.f32 %v172_v33, %v157_v26 }
 0x248   :  { %v175_v35 = vpack.c.bf16 %v174_v34, %v174_v34 }
 0x24a   :  { %177 = vrot.lane.b32.xlu1 %v175_v35, %s900_s2 }
 0x2bc   :  { %v178_v36 = vpop.permute.xlu1 %177 }
 0x2bd   :  { %798 = vmatmul.mubr.msk.bf16.vlgmr.msra.gmra.mxu0 %vm110_vm2, %v178_v36 }
 0x2be   :  { %810 = vmatpush3.bf16.msra.mxu0 %v939_v3  ;;  %813 = vmatprep.mubr.msk.bf16.mxu0 %vm898_vm0, %v896_v0 }
 0x2bf   :  { %811 = vmatprep.subr.bf16.mxu0 %v896_v0 }
 0x2c2   :  { %812 = vmatpush3.bf16.msra.mxu0 %v956_v8 }
 0x2c3   :  { %825 = vmatprep.subr.bf16.mxu0 %v896_v0 }
 0x37d   :  { %v216_v38 = vpop.f32.mrf.mxu0 }
 0x37e   :  { %v223_v39 = vrot.slane %v216_v38, 6 }
 0x37f   :  { %v799_v40 = vpop.f32.mrf.mxu0 }
 0x380   :  { %v225_v41 = vadd.f32 %v223_v39, %v983_v15 }
 0x381   :  { %v219_v42 = vpop.f32.mrf.mxu0 }
 0x382   :  { %864 = vtanh.f32 %v225_v41 }
 0x383   :  { %v800_v43 = vpop.f32.mrf.mxu0 }
 0x38f   :  { %v865_v44 = vpop.eup %864 }
 0x390   :  { %234 = vrot.lane.b32.xlu0 %v865_v44, %s899_s3  ;;  %v227_v45 = vmul.f32 0.5, %v865_v44 }
 0x392   :  { %v228_v46 = vadd.f32 0.5, %v227_v45 }
 0x394   :  { %v232_v50 = vmul.f32 %v230_v49, %v228_v46 }
 0x402   :  { %v235_v47 = vpop.permute.xlu0 %234 }
 0x403   :  { %v237_v48 = vmul.f32 %v235_v47, %v228_v46 }
 0x405   :  { %239 = vrot.lane.b32.xlu1 %v237_v48, %s899_s3 }
 0x477   :  { %v240_v51 = vpop.permute.xlu1 %239 }
 0x478   :  { %v242_v52 = vadd.f32 %v240_v51, %v232_v50 }
 0x47a   :  { %866 = vtanh.f32 %v242_v52  ;;  %v305_v9 = vrot.slane %v242_v52, 6 }
 0x487   :  { %v867_v53 = vpop.eup %866 }
 0x488   :  { %245 = vrot.lane.b32.xlu0 %v867_v53, %s899_s3 }
 0x4fa   :  { %v246_v54 = vpop.permute.xlu0 %245 }
 0x4fb   :  { %v248_v55 = vmul.f32 %v246_v54, %v228_v46 }
 0x4fd   :  { %v249_v56 = vpack.c.bf16 %v248_v55, %v248_v55 }
 0x4ff   :  { %v251_v57 = vrot.slane %v249_v56, 1 }
 0x501   :  { %252 = vrot.lane.b32.xlu1 %v251_v57, %s900_s2 }
 0x573   :  { %v253_v58 = vpop.permute.xlu1 %252 }
 0x574   :  { %806 = vmatmul.mubr.msk.bf16.vlgmr.msra.gmra.mxu1 %vm110_vm2, %v253_v58 }
 0x575   :  { %818 = vmatpush3.bf16.msra.mxu1 %v939_v3  ;;  %821 = vmatprep.mubr.msk.bf16.mxu1 %vm898_vm0, %v896_v0 }
 0x576   :  { %819 = vmatprep.subr.bf16.mxu1 %v896_v0 }
 0x579   :  { %820 = vmatpush3.bf16.msra.mxu1 %v956_v8 }
 0x57a   :  { %833 = vmatprep.subr.bf16.mxu1 %v896_v0 }
 0x634   :  { %v291_v59 = vpop.f32.mrf.mxu1 }
 0x635   :  { %v298_v60 = vrot.slane %v291_v59, 4 }
 0x636   :  { %v807_v61 = vpop.f32.mrf.mxu1 }
 0x637   :  { %v300_v62 = vadd.f32 %v298_v60, %v983_v15 }
 0x638   :  { %v294_v63 = vpop.f32.mrf.mxu1 }
 0x639   :  { %868 = vtanh.f32 %v300_v62 }
 0x63a   :  { %v808_v1 = vpop.f32.mrf.mxu1 }
 0x646   :  { %v869_v2 = vpop.eup %868 }
 0x647   :  { %309 = vrot.lane.b32.xlu0 %v869_v2, %s899_s3  ;;  %v302_v4 = vmul.f32 0.5, %v869_v2 }
 0x649   :  { %v303_v5 = vadd.f32 0.5, %v302_v4 }
 0x64b   :  { %v307_v11 = vmul.f32 %v305_v9, %v303_v5 }
 0x6b9   :  { %v310_v6 = vpop.permute.xlu0 %309 }
 0x6ba   :  { %v312_v7 = vmul.f32 %v310_v6, %v303_v5 }
 0x6bc   :  { %314 = vrot.lane.b32.xlu1 %v312_v7, %s899_s3 }
 0x72e   :  { %v315_v13 = vpop.permute.xlu1 %314 }
 0x72f   :  { %v317_v14 = vadd.f32 %v315_v13, %v307_v11 }
 0x731   :  { %870 = vtanh.f32 %v317_v14  ;;  %v380_v34 = vrot.slane %v317_v14, 6 }
 0x73e   :  { %v871_v16 = vpop.eup %870 }
 0x73f   :  { %320 = vrot.lane.b32.xlu0 %v871_v16, %s899_s3 }
 0x7b1   :  { %v321_v17 = vpop.permute.xlu0 %320 }
 0x7b2   :  { %v323_v18 = vmul.f32 %v321_v17, %v303_v5 }
 0x7b4   :  { %v324_v19 = vpack.c.bf16 %v323_v18, %v323_v18 }
 0x7b6   :  { %v326_v21 = vrot.slane %v324_v19, 2 }
 0x7b8   :  { %327 = vrot.lane.b32.xlu1 %v326_v21, %s900_s2 }
 0x82a   :  { %v328_v22 = vpop.permute.xlu1 %327 }
 0x82b   :  { %814 = vmatmul.mubr.msk.bf16.vlgmr.msra.gmra.mxu0 %vm110_vm2, %v328_v22 }
 0x82c   :  { %826 = vmatpush3.bf16.msra.mxu0 %v939_v3  ;;  %829 = vmatprep.mubr.msk.bf16.mxu0 %vm898_vm0, %v896_v0 }
 0x82d   :  { %827 = vmatprep.subr.bf16.mxu0 %v896_v0 }
 0x830   :  { %828 = vmatpush3.bf16.msra.mxu0 %v956_v8 }
 0x831   :  { %841 = vmatprep.subr.bf16.mxu0 %v896_v0 }
 0x8eb   :  { %v366_v23 = vpop.f32.mrf.mxu0 }
 0x8ec   :  { %v373_v24 = vrot.slane %v366_v23, 2 }
 0x8ed   :  { %v815_v25 = vpop.f32.mrf.mxu0 }
 0x8ee   :  { %v375_v26 = vadd.f32 %v373_v24, %v983_v15 }
 0x8ef   :  { %v369_v27 = vpop.f32.mrf.mxu0 }
 0x8f0   :  { %872 = vtanh.f32 %v375_v26 }
 0x8f1   :  { %v816_v28 = vpop.f32.mrf.mxu0 }
 0x8fd   :  { %v873_v29 = vpop.eup %872 }
 0x8fe   :  { %384 = vrot.lane.b32.xlu0 %v873_v29, %s899_s3  ;;  %v377_v30 = vmul.f32 0.5, %v873_v29 }
 0x900   :  { %v378_v31 = vadd.f32 0.5, %v377_v30 }
 0x902   :  { %v382_v35 = vmul.f32 %v380_v34, %v378_v31 }
 0x970   :  { %v385_v32 = vpop.permute.xlu0 %384 }
 0x971   :  { %v387_v33 = vmul.f32 %v385_v32, %v378_v31 }
 0x973   :  { %389 = vrot.lane.b32.xlu1 %v387_v33, %s899_s3 }
 0x9e5   :  { %v390_v36 = vpop.permute.xlu1 %389 }
 0x9e6   :  { %v392_v38 = vadd.f32 %v390_v36, %v382_v35 }
 0x9e8   :  { %874 = vtanh.f32 %v392_v38  ;;  %v452_v54 = vrot.slane %v392_v38, 6 }
 0x9f5   :  { %v875_v39 = vpop.eup %874 }
 0x9f6   :  { %395 = vrot.lane.b32.xlu0 %v875_v39, %s899_s3 }
 0xa68   :  { %v396_v15 = vpop.permute.xlu0 %395 }
 0xa69   :  { %v398_v40 = vmul.f32 %v396_v15, %v378_v31 }
 0xa6b   :  { %v399_v41 = vpack.c.bf16 %v398_v40, %v398_v40 }
 0xa6d   :  { %v401_v42 = vrot.slane %v399_v41, 3 }
 0xa6f   :  { %402 = vrot.lane.b32.xlu1 %v401_v42, %s900_s2 }
 0xae1   :  { %v403_v43 = vpop.permute.xlu1 %402 }
 0xae2   :  { %822 = vmatmul.mubr.msk.bf16.vlgmr.msra.gmra.mxu1 %vm110_vm2, %v403_v43 }
 0xae3   :  { %834 = vmatpush3.bf16.msra.mxu1 %v939_v3  ;;  %837 = vmatprep.mubr.msk.bf16.mxu1 %vm898_vm0, %v896_v0 }
 0xae4   :  { %835 = vmatprep.subr.bf16.mxu1 %v896_v0 }
 0xae7   :  { %836 = vmatpush3.bf16.msra.mxu1 %v956_v8 }
 0xba2   :  { %v441_v44 = vpop.f32.mrf.mxu1 }
 0xba3   :  { %v447_v45 = vadd.f32 %v441_v44, %v986_v20 }
 0xba4   :  { %v823_v46 = vpop.f32.mrf.mxu1 }
 0xba5   :  { %876 = vtanh.f32 %v447_v45  ;;  %v34_v45 = vsub.s32 1, %v974_v10 }
 0xba6   :  { %v444_v47 = vpop.f32.mrf.mxu1 }
 0xba7   :  { %v35_v47 = vrot.slane %v980_v12, %v34_v45 }
 0xba8   :  { %v824_v48 = vpop.f32.mrf.mxu1 }
 0xbb2   :  { %v877_v49 = vpop.eup %876 }
 0xbb3   :  { %456 = vrot.lane.b32.xlu0 %v877_v49, %s899_s3  ;;  %v449_v50 = vmul.f32 0.5, %v877_v49 }
 0xbb5   :  { %v450_v51 = vadd.f32 0.5, %v449_v50 }
 0xbb7   :  { %v454_v55 = vmul.f32 %v452_v54, %v450_v51 }
 0xc25   :  { %v457_v52 = vpop.permute.xlu0 %456 }
 0xc26   :  { %v459_v53 = vmul.f32 %v457_v52, %v450_v51  ;;  %v92_v52 = vadd.f32 %v999_v37, %v35_v47 }
 0xc28   :  { %461 = vrot.lane.b32.xlu1 %v459_v53, %s899_s3 }
 0xc9a   :  { %v462_v56 = vpop.permute.xlu1 %461 }
 0xc9b   :  { %v464_v57 = vadd.f32 %v462_v56, %v454_v55 }
 0xc9d   :  { %878 = vtanh.f32 %v464_v57 }
 0xcaa   :  { %v879_v58 = vpop.eup %878 }
 0xcab   :  { %467 = vrot.lane.b32.xlu0 %v879_v58, %s899_s3 }
 0xd1d   :  { %v468_v59 = vpop.permute.xlu0 %467 }
 0xd1e   :  { %v470_v60 = vmul.f32 %v468_v59, %v450_v51 }
 0xd20   :  { %v471_v61 = vpack.c.bf16 %v470_v60, %v470_v60 }
 0xd22   :  { %473 = vrot.lane.b32.xlu1 %v471_v61, %s900_s2 }
 0xd94   :  { %v474_v62 = vpop.permute.xlu1 %473 }
 0xd95   :  { %830 = vmatmul.mubr.msk.bf16.vlgmr.msra.gmra.mxu0 %vm110_vm2, %v474_v62 }
 0xd96   :  { %842 = vmatpush3.bf16.msra.mxu0 %v939_v3  ;;  %845 = vmatprep.mubr.msk.bf16.mxu0 %vm898_vm0, %v896_v0 }
 0xd97   :  { %843 = vmatprep.subr.bf16.mxu0 %v896_v0  ;;  %v526_v0 = vrot.slane %v464_v57, 6 }
 0xd9a   :  { %844 = vmatpush3.bf16.msra.mxu0 %v956_v8 }
 0xe55   :  { %v512_v63 = vpop.f32.mrf.mxu0 }
 0xe56   :  { %v519_v1 = vrot.slane %v512_v63, 6 }
 0xe57   :  { %v831_v2 = vpop.f32.mrf.mxu0 }
 0xe58   :  { %v521_v4 = vadd.f32 %v519_v1, %v986_v20 }
 0xe59   :  { %v515_v5 = vpop.f32.mrf.mxu0 }
 0xe5a   :  { %880 = vtanh.f32 %v521_v4  ;;  %v760_v5 = vld [vmem:[%s1081_s4] ss:$0 sm:$0xff] }
 0xe5b   :  { %v832_v6 = vpop.f32.mrf.mxu0 }
 0xe67   :  { %v881_v7 = vpop.eup %880 }
 0xe68   :  { %530 = vrot.lane.b32.xlu0 %v881_v7, %s899_s3  ;;  %v523_v9 = vmul.f32 0.5, %v881_v7 }
 0xe6a   :  { %v524_v3 = vadd.f32 0.5, %v523_v9 }
 0xe6c   :  { %v528_v14 = vmul.f32 %v526_v0, %v524_v3 }
 0xeda   :  { %v531_v11 = vpop.permute.xlu0 %530 }
 0xedb   :  { %v533_v13 = vmul.f32 %v531_v11, %v524_v3 }
 0xedd   :  { %535 = vrot.lane.b32.xlu1 %v533_v13, %s899_s3 }
 0xf4f   :  { %v536_v8 = vpop.permute.xlu1 %535 }
 0xf50   :  { %v538_v16 = vadd.f32 %v536_v8, %v528_v14 }
 0xf52   :  { %882 = vtanh.f32 %v538_v16  ;;  %v601_v35 = vrot.slane %v538_v16, 6 }
 0xf5f   :  { %v883_v17 = vpop.eup %882 }
 0xf60   :  { %541 = vrot.lane.b32.xlu0 %v883_v17, %s899_s3 }
 0xfd2   :  { %v542_v18 = vpop.permute.xlu0 %541 }
 0xfd3   :  { %v544_v19 = vmul.f32 %v542_v18, %v524_v3 }
 0xfd5   :  { %v545_v21 = vpack.c.bf16 %v544_v19, %v544_v19 }
 0xfd7   :  { %v547_v22 = vrot.slane %v545_v21, 1 }
 0xfd9   :  { %548 = vrot.lane.b32.xlu1 %v547_v22, %s900_s2 }
0x104b   :  { %v549_v23 = vpop.permute.xlu1 %548 }
0x104c   :  { %838 = vmatmul.mubr.msk.bf16.vlgmr.msra.gmra.mxu1 %vm110_vm2, %v549_v23 }
0x110c   :  { %v587_v24 = vpop.f32.mrf.mxu1 }
0x110d   :  { %v594_v25 = vrot.slane %v587_v24, 4 }
0x110e   :  { %v839_v26 = vpop.f32.mrf.mxu1 }
0x110f   :  { %v596_v27 = vadd.f32 %v594_v25, %v986_v20 }
0x1110   :  { %v590_v28 = vpop.f32.mrf.mxu1 }
0x1111   :  { %884 = vtanh.f32 %v596_v27 }
0x1112   :  { %v840_v29 = vpop.f32.mrf.mxu1 }
0x111e   :  { %v885_v30 = vpop.eup %884 }
0x111f   :  { %605 = vrot.lane.b32.xlu0 %v885_v30, %s899_s3  ;;  %v598_v31 = vmul.f32 0.5, %v885_v30 }
0x1121   :  { %v599_v32 = vadd.f32 0.5, %v598_v31 }
0x1123   :  { %v603_v36 = vmul.f32 %v601_v35, %v599_v32 }
0x1191   :  { %v606_v33 = vpop.permute.xlu0 %605 }
0x1192   :  { %v608_v34 = vmul.f32 %v606_v33, %v599_v32 }
0x1194   :  { %610 = vrot.lane.b32.xlu1 %v608_v34, %s899_s3 }
0x1206   :  { %v611_v38 = vpop.permute.xlu1 %610 }
0x1207   :  { %v613_v39 = vadd.f32 %v611_v38, %v603_v36 }
0x1209   :  { %886 = vtanh.f32 %v613_v39  ;;  %v676_v61 = vrot.slane %v613_v39, 6 }
0x1216   :  { %v887_v15 = vpop.eup %886 }
0x1217   :  { %616 = vrot.lane.b32.xlu0 %v887_v15, %s899_s3 }
0x1289   :  { %v617_v40 = vpop.permute.xlu0 %616 }
0x128a   :  { %v619_v41 = vmul.f32 %v617_v40, %v599_v32 }
0x128c   :  { %v620_v42 = vpack.c.bf16 %v619_v41, %v619_v41 }
0x128e   :  { %v622_v43 = vrot.slane %v620_v42, 2 }
0x1290   :  { %623 = vrot.lane.b32.xlu1 %v622_v43, %s900_s2 }
0x1302   :  { %v624_v44 = vpop.permute.xlu1 %623 }
0x1303   :  { %846 = vmatmul.mubr.msk.bf16.vlgmr.msra.gmra.mxu0 %vm110_vm2, %v624_v44 }
0x13c3   :  { %v662_v46 = vpop.f32.mrf.mxu0 }
0x13c4   :  { %v669_v48 = vrot.slane %v662_v46, 2 }
0x13c5   :  { %v847_v49 = vpop.f32.mrf.mxu0 }
0x13c6   :  { %v671_v50 = vadd.f32 %v669_v48, %v986_v20 }
0x13c7   :  { %v665_v51 = vpop.f32.mrf.mxu0 }
0x13c8   :  { %888 = vtanh.f32 %v671_v50 }
0x13c9   :  { %v848_v53 = vpop.f32.mrf.mxu0  ;;  %890 = vtanh.f32 %v92_v52 }
0x13d5   :  { %v889_v54 = vpop.eup %888 }
0x13d6   :  { %680 = vrot.lane.b32.xlu0 %v889_v54, %s899_s3  ;;  %v891_v55 = vpop.eup %890  ;;  %v673_v10 = vmul.f32 0.5, %v889_v54 }
0x13d7   :  { %v696_v57 = vmul.f32 0.5, %v891_v55 }
0x13d8   :  { %v674_v56 = vadd.f32 0.5, %v673_v10 }
0x13d9   :  { %v697_v20 = vadd.f32 0.5, %v696_v57 }
0x13da   :  { %699 = vrot.lane.b32.xlu0 %v891_v55, %s900_s2  ;;  %v678_v62 = vmul.f32 %v676_v61, %v674_v56 }
0x1448   :  { %v681_v12 = vpop.permute.xlu0 %680 }
0x1449   :  { %v683_v58 = vmul.f32 %v681_v12, %v674_v56 }
0x144b   :  { %685 = vrot.lane.b32.xlu1 %v683_v58, %s899_s3 }
0x144c   :  { %v700_v59 = vpop.permute.xlu0 %699 }
0x144d   :  { %v702_v60 = vmul.f32 %v700_v59, %v697_v20 }
0x144f   :  { %892 = vtanh.f32 %v702_v60 }
0x145c   :  { %v893_v37 = vpop.eup %892 }
0x145d   :  { %705 = vrot.lane.b32.xlu0 %v893_v37, %s899_s3 }
0x14bd   :  { %v686_v63 = vpop.permute.xlu1 %685 }
0x14be   :  { %v688_v1 = vadd.f32 %v686_v63, %v678_v62 }
0x14c0   :  { %894 = vtanh.f32 %v688_v1 }
0x14cd   :  { %v895_v2 = vpop.eup %894 }
0x14ce   :  { %691 = vrot.lane.b32.xlu1 %v895_v2, %s899_s3 }
0x14cf   :  { %v706_v4 = vpop.permute.xlu0 %705 }
0x14d0   :  { %v708_v6 = vmul.f32 %v706_v4, %v697_v20 }
0x14d2   :  { %715 = vrot.lane.b32.xlu1 %v760_v5, %s900_s2  ;;  %v728_v7 = vmul.f32 %v760_v5, %v708_v6 }
0x14d6   :  { %730 = vrot.lane.b32.xlu1 %v728_v7, %s901_s7 }
0x1540   :  { %v692_v9 = vpop.permute.xlu1 %691 }
0x1541   :  { %v694_v3 = vmul.f32 %v692_v9, %v674_v56 }
0x1544   :  { %v716_v11 = vpop.permute.xlu1 %715 }
0x1545   :  { %v718_v13 = vmul.f32 %v716_v11, %v694_v3 }
0x1547   :  { %720 = vrot.lane.b32.xlu0 %v718_v13, %s900_s2 }
0x1548   :  { %v731_v0 = vpop.permute.xlu1 %730 }
0x1549   :  { %v733_v14 = vsel %vm723_vm3, %v731_v0, 0.0 }
0x154a   :  { %734 = vadd.xlane.f32.xlu1 %v733_v14 }
0x15b9   :  { %v721_v8 = vpop.permute.xlu0 %720 }
0x15ba   :  { %v724_v16 = vsel %vm723_vm3, %v721_v8, 0.0 }
0x15bb   :  { %725 = vadd.xlane.f32.xlu0 %v724_v16 }
0x15d3   :  { %v735_v17 = vpop.xlane.xlu1 %734 }
0x1644   :  { %v726_v18 = vpop.xlane.xlu0 %725 }
0x1645   :  { %v736_v19 = vadd.f32 %v735_v17, %v726_v18 }
0x1647   :  { %v737_v21 = vadd.f32 %v760_v5, %v736_v19 }
0x1649   :  { %739 = vrot.lane.b32.xlu0 %v737_v21, %s900_s2 }
0x16bb   :  { %v740_v22 = vpop.permute.xlu0 %739 }
0x16bc   :  { %743 = vst.msk [vmem:[%s1082_s5 - $0x6] sm:$0xc0] %vm742_vm4, %v740_v22 }

</bundles_post_ra>
